<compile_context>
chip_gen: v7x
topology: tpu7x:2x2x1
jax: 0.10.0
libtpu: 0.0.40
codegen_flags: <defaults>
</compile_context>

<pallas_src>
import functools

import numpy as np
import jax
import jax.numpy as jnp
from jax import lax
from jax.experimental import pallas as pl
from jax.experimental.pallas import tpu as pltpu

STEP_SIZE = 256


def _chunk_loss_kernel(t_ref, o_ref, w_ref, out_ref, acc_ref, *,
                       tile_d, d_valid, needs_mask):
    j = pl.program_id(0)

    @pl.when(j == 0)
    def _():
        acc_ref[...] = jnp.zeros_like(acc_ref)

    # Walk the tile in 128-lane strips: each strip is (N, 128); per-strip work
    # is VPU-only (sub, two muls, optional select, add into the lane-dense
    # accumulator).  No cross-lane reduction inside the grid loop.
    acc = acc_ref[...]
    for c in range(tile_d // 128):
        sl = pl.ds(c * 128, 128)
        t = t_ref[:, sl].astype(jnp.float32)
        o = o_ref[:, sl].astype(jnp.float32)
        diff = t - o
        wsq = diff * diff * w_ref[:, sl]
        if needs_mask:
            # The last block may read past D (partial blocks contain
            # unspecified data); zero those lanes so garbage/NaN can't leak in.
            col = (j * tile_d + c * 128
                   + lax.broadcasted_iota(jnp.int32, (1, 128), 1))
            wsq = jnp.where(col < d_valid, wsq, 0.0)
        acc = acc + wsq
    acc_ref[...] = acc

    @pl.when(j == pl.num_programs(0) - 1)
    def _():
        # Single cross-lane/sublane reduce + scalar store for the whole kernel.
        out_ref[...] = jnp.sum(acc_ref[...], keepdims=True)


def _column_weights(n, d, step_size):
    """Static per-column weights implied by the chunk loop (shape-only)."""
    w = np.zeros((d,), dtype=np.float64)
    for i in range(n, step_size):
        wi = min(d, i + step_size) - i            # > 0 whenever d >= step_size
        w[i:i + wi] += 1.0 / (float(n) * float(n) * float(wi))
    return w.astype(np.float32)


def chunkwise_recon_loss(target, output, step_size=STEP_SIZE, *,
                         max_tile_d=8192,
                         vmem_budget_bytes=8 * 1024 * 1024):
    # torch.flatten(start_dim=1) equivalent (glue).
    if output.ndim > 2:
        output = output.reshape(output.shape[0], -1)
        target = target.reshape(target.shape[0], -1)
    n, d = output.shape

    # range(n, step_size) is empty -> loss is exactly 0; skip the kernel
    # (the common large-batch case -- avoids streaming 2*N*D bytes for nothing).
    if n >= step_size:
        return jnp.float32(0.0)

    # Some chunk slice [i, i+S) starts past D -> torch.mean of an empty slice
    # is nan, which poisons the whole sum.  Result is nan regardless of the
    # finite contributions, so skip the kernel.
    if d < step_size:
        return jnp.float32(jnp.nan)

    # Size the feature tile so that
    #   2 inputs * 2 pipeline buffers * N * tile_d * itemsize <= budget,
    # staying well inside the scoped-VMEM default on every generation
    # (16 MiB v5e / 32 MiB v6e / 32 MiB v7x) while being lane-wide enough
    # to sit near the HBM streaming roofline.
    itemsize = max(jnp.dtype(target.dtype).itemsize,
                   jnp.dtype(output.dtype).itemsize)
    d_pad = ((d + 127) // 128) * 128
    lanes = vmem_budget_bytes // (2 * 2 * n * itemsize)
    tile_d = max(128, min((lanes // 128) * 128, max_tile_d, d_pad))
    num_blocks = pl.cdiv(d_pad, tile_d)
    d_span = num_blocks * tile_d
    needs_mask = (d_span != d)

    # Static per-column weights, zero-padded to the tiled span so the (small)
    # weight array never reads out of bounds.  NOTE: no jnp.pad of the big
    # input tensors -- the tail block is masked in-kernel instead.
    w = np.zeros((1, d_span), dtype=np.float32)
    w[0, :d] = _column_weights(n, d, step_size)
    w = jnp.asarray(w)

    kernel = functools.partial(_chunk_loss_kernel, tile_d=tile_d, d_valid=d,
                               needs_mask=needs_mask)

    bytes_accessed = (n * d * (jnp.dtype(target.dtype).itemsize
                               + jnp.dtype(output.dtype).itemsize)
                      + d_span * 4 + 4)

    loss = pl.pallas_call(
        kernel,
        out_shape=jax.ShapeDtypeStruct((1, 1), jnp.float32),
        grid_spec=pltpu.PrefetchScalarGridSpec(
            num_scalar_prefetch=0,
            grid=(num_blocks,),
            in_specs=[
                pl.BlockSpec((n, tile_d), lambda j: (0, j)),
                pl.BlockSpec((n, tile_d), lambda j: (0, j)),
                pl.BlockSpec((1, tile_d), lambda j: (0, j)),
            ],
            out_specs=pl.BlockSpec((1, 1), lambda j: (0, 0)),
            scratch_shapes=[pltpu.VMEM((n, 128), jnp.float32)],
        ),
        compiler_params=pltpu.CompilerParams(
            dimension_semantics=("arbitrary",)),
        cost_estimate=pl.CostEstimate(
            flops=4 * n * d,
            transcendentals=0,
            bytes_accessed=int(bytes_accessed)),
    )(target, output, w)[0, 0]
    # TODO(synk): on v7x the stream could additionally be split across the two
    # TensorCores with a leading "parallel" grid axis producing per-core
    # partial sums; kept single-core here since v5e/v6e have one TC.
    return loss


def _ref_loss(target, output, step_size=STEP_SIZE):
    """Pure NumPy reference reproducing the PyTorch forward literally."""
    t = np.asarray(target).reshape(target.shape[0], -1).astype(np.float32)
    o = np.asarray(output).reshape(output.shape[0], -1).astype(np.float32)
    n = o.shape[0]
    loss = np.float32(0.0)
    for i in range(n, step_size):
        tt = t[:, i:i + step_size]
        oo = o[:, i:i + step_size]
        l = np.mean((tt - oo) ** 2, dtype=np.float32) / n
        loss = loss + np.float32(l)
    return np.float32(loss)


if __name__ == "__main__":
    key = jax.random.PRNGKey(0)
    k1, k2 = jax.random.split(key)
    # NCHW-like inputs: batch=2, channels=4, spatial=16x16 -> flattened D=1024
    target = jax.random.normal(k1, (2, 4, 16, 16), dtype=jnp.float32)
    output = jax.random.normal(k2, (2, 4, 16, 16), dtype=jnp.float32)

    loss = jax.block_until_ready(chunkwise_recon_loss(target, output))
    np.testing.assert_allclose(np.asarray(loss), _ref_loss(target, output),
                               rtol=1e-5, atol=1e-6)

    # Second case: bf16 inputs kept in native dtype end-to-end and a feature
    # dim (5*7*9 = 315) that is not a multiple of 128, exercising the masked
    # tail-block path.
    k3, k4 = jax.random.split(k2)
    t2 = jax.random.normal(k3, (3, 5, 7, 9), dtype=jnp.float32).astype(jnp.bfloat16)
    o2 = jax.random.normal(k4, (3, 5, 7, 9), dtype=jnp.float32).astype(jnp.bfloat16)
    loss2 = jax.block_until_ready(chunkwise_recon_loss(t2, o2))
    np.testing.assert_allclose(np.asarray(loss2), _ref_loss(t2, o2),
                               rtol=1e-4, atol=1e-6)

    print("KERNEL_OK")
</pallas_src>

<mosaic_0001>
module attributes {stable_mosaic.version = 11 : i64} {
  func.func @_chunk_loss_kernel(%arg0: i32, %arg1: memref<2x1024xf32, #tpu.memory_space<vmem>>, %arg2: memref<2x1024xf32, #tpu.memory_space<vmem>>, %arg3: memref<1x1024xf32, #tpu.memory_space<vmem>>, %arg4: memref<1x1xf32, #tpu.memory_space<vmem>>, %arg5: memref<2x128xf32, #tpu.memory_space<vmem>>) attributes {dimension_semantics = [#tpu.dimension_semantics<arbitrary>], iteration_bounds = array<i64: 1>, scalar_prefetch = 0 : i64, scratch_operands = 1 : i64, tpu.core_type = #tpu.core_type<tc>, window_params = [{transform_indices = @transform_0, window_bounds = array<i64: 2, 1024>}, {transform_indices = @transform_1, window_bounds = array<i64: 2, 1024>}, {transform_indices = @transform_2, window_bounds = array<i64: 1, 1024>}, {pipeline_mode = #tpu.pipeline_mode<synchronous>, transform_indices = @transform_3, window_bounds = array<i64: 1, 1>}]} {
    %c0_i32 = arith.constant 0 : i32
    %0 = arith.cmpi eq, %arg0, %c0_i32 : i32
    %1 = arith.extui %0 : i1 to i32
    %c0_i32_0 = arith.constant 0 : i32
    %2 = arith.cmpi ne, %1, %c0_i32_0 : i32
    scf.if %2 {
      %cst = arith.constant 0.000000e+00 : f32
      %72 = vector.broadcast %cst : f32 to vector<2x128xf32>
      %c0_47 = arith.constant 0 : index
      %c0_48 = arith.constant 0 : index
      %73 = vector.load %arg5[%c0_47, %c0_48] : memref<2x128xf32, #tpu.memory_space<vmem>>, vector<2x128xf32>
      tpu.vector_store %arg5[%c0_47, %c0_48], %72 {strides = array<i32>} : memref<2x128xf32, #tpu.memory_space<vmem>>, vector<2x128xf32>,
    } else {
    }
    %c0 = arith.constant 0 : index
    %c0_1 = arith.constant 0 : index
    %3 = vector.load %arg5[%c0, %c0_1] : memref<2x128xf32, #tpu.memory_space<vmem>>, vector<2x128xf32>
    %c0_2 = arith.constant 0 : index
    %c0_3 = arith.constant 0 : index
    %4 = vector.load %arg1[%c0_2, %c0_3] : memref<2x1024xf32, #tpu.memory_space<vmem>>, vector<2x128xf32>
    %c0_4 = arith.constant 0 : index
    %c0_5 = arith.constant 0 : index
    %5 = vector.load %arg2[%c0_4, %c0_5] : memref<2x1024xf32, #tpu.memory_space<vmem>>, vector<2x128xf32>
    %6 = arith.subf %4, %5 : vector<2x128xf32>
    %7 = arith.mulf %6, %6 : vector<2x128xf32>
    %c0_6 = arith.constant 0 : index
    %c0_7 = arith.constant 0 : index
    %8 = vector.load %arg3[%c0_6, %c0_7] : memref<1x1024xf32, #tpu.memory_space<vmem>>, vector<1x128xf32>
    %9 = vector.broadcast %8 : vector<1x128xf32> to vector<2x128xf32>
    %10 = arith.mulf %7, %9 : vector<2x128xf32>
    %11 = arith.addf %3, %10 : vector<2x128xf32>
    %c0_8 = arith.constant 0 : index
    %c128 = arith.constant 128 : index
    %12 = vector.load %arg1[%c0_8, %c128] : memref<2x1024xf32, #tpu.memory_space<vmem>>, vector<2x128xf32>
    %c0_9 = arith.constant 0 : index
    %c128_10 = arith.constant 128 : index
    %13 = vector.load %arg2[%c0_9, %c128_10] : memref<2x1024xf32, #tpu.memory_space<vmem>>, vector<2x128xf32>
    %14 = arith.subf %12, %13 : vector<2x128xf32>
    %15 = arith.mulf %14, %14 : vector<2x128xf32>
    %c0_11 = arith.constant 0 : index
    %c128_12 = arith.constant 128 : index
    %16 = vector.load %arg3[%c0_11, %c128_12] : memref<1x1024xf32, #tpu.memory_space<vmem>>, vector<1x128xf32>
    %17 = vector.broadcast %16 : vector<1x128xf32> to vector<2x128xf32>
    %18 = arith.mulf %15, %17 : vector<2x128xf32>
    %19 = arith.addf %11, %18 : vector<2x128xf32>
    %c0_13 = arith.constant 0 : index
    %c256 = arith.constant 256 : index
    %20 = vector.load %arg1[%c0_13, %c256] : memref<2x1024xf32, #tpu.memory_space<vmem>>, vector<2x128xf32>
    %c0_14 = arith.constant 0 : index
    %c256_15 = arith.constant 256 : index
    %21 = vector.load %arg2[%c0_14, %c256_15] : memref<2x1024xf32, #tpu.memory_space<vmem>>, vector<2x128xf32>
    %22 = arith.subf %20, %21 : vector<2x128xf32>
    %23 = arith.mulf %22, %22 : vector<2x128xf32>
    %c0_16 = arith.constant 0 : index
    %c256_17 = arith.constant 256 : index
    %24 = vector.load %arg3[%c0_16, %c256_17] : memref<1x1024xf32, #tpu.memory_space<vmem>>, vector<1x128xf32>
    %25 = vector.broadcast %24 : vector<1x128xf32> to vector<2x128xf32>
    %26 = arith.mulf %23, %25 : vector<2x128xf32>
    %27 = arith.addf %19, %26 : vector<2x128xf32>
    %c0_18 = arith.constant 0 : index
    %c384 = arith.constant 384 : index
    %28 = vector.load %arg1[%c0_18, %c384] : memref<2x1024xf32, #tpu.memory_space<vmem>>, vector<2x128xf32>
    %c0_19 = arith.constant 0 : index
    %c384_20 = arith.constant 384 : index
    %29 = vector.load %arg2[%c0_19, %c384_20] : memref<2x1024xf32, #tpu.memory_space<vmem>>, vector<2x128xf32>
    %30 = arith.subf %28, %29 : vector<2x128xf32>
    %31 = arith.mulf %30, %30 : vector<2x128xf32>
    %c0_21 = arith.constant 0 : index
    %c384_22 = arith.constant 384 : index
    %32 = vector.load %arg3[%c0_21, %c384_22] : memref<1x1024xf32, #tpu.memory_space<vmem>>, vector<1x128xf32>
    %33 = vector.broadcast %32 : vector<1x128xf32> to vector<2x128xf32>
    %34 = arith.mulf %31, %33 : vector<2x128xf32>
    %35 = arith.addf %27, %34 : vector<2x128xf32>
    %c0_23 = arith.constant 0 : index
    %c512 = arith.constant 512 : index
    %36 = vector.load %arg1[%c0_23, %c512] : memref<2x1024xf32, #tpu.memory_space<vmem>>, vector<2x128xf32>
    %c0_24 = arith.constant 0 : index
    %c512_25 = arith.constant 512 : index
    %37 = vector.load %arg2[%c0_24, %c512_25] : memref<2x1024xf32, #tpu.memory_space<vmem>>, vector<2x128xf32>
    %38 = arith.subf %36, %37 : vector<2x128xf32>
    %39 = arith.mulf %38, %38 : vector<2x128xf32>
    %c0_26 = arith.constant 0 : index
    %c512_27 = arith.constant 512 : index
    %40 = vector.load %arg3[%c0_26, %c512_27] : memref<1x1024xf32, #tpu.memory_space<vmem>>, vector<1x128xf32>
    %41 = vector.broadcast %40 : vector<1x128xf32> to vector<2x128xf32>
    %42 = arith.mulf %39, %41 : vector<2x128xf32>
    %43 = arith.addf %35, %42 : vector<2x128xf32>
    %c0_28 = arith.constant 0 : index
    %c640 = arith.constant 640 : index
    %44 = vector.load %arg1[%c0_28, %c640] : memref<2x1024xf32, #tpu.memory_space<vmem>>, vector<2x128xf32>
    %c0_29 = arith.constant 0 : index
    %c640_30 = arith.constant 640 : index
    %45 = vector.load %arg2[%c0_29, %c640_30] : memref<2x1024xf32, #tpu.memory_space<vmem>>, vector<2x128xf32>
    %46 = arith.subf %44, %45 : vector<2x128xf32>
    %47 = arith.mulf %46, %46 : vector<2x128xf32>
    %c0_31 = arith.constant 0 : index
    %c640_32 = arith.constant 640 : index
    %48 = vector.load %arg3[%c0_31, %c640_32] : memref<1x1024xf32, #tpu.memory_space<vmem>>, vector<1x128xf32>
    %49 = vector.broadcast %48 : vector<1x128xf32> to vector<2x128xf32>
    %50 = arith.mulf %47, %49 : vector<2x128xf32>
    %51 = arith.addf %43, %50 : vector<2x128xf32>
    %c0_33 = arith.constant 0 : index
    %c768 = arith.constant 768 : index
    %52 = vector.load %arg1[%c0_33, %c768] : memref<2x1024xf32, #tpu.memory_space<vmem>>, vector<2x128xf32>
    %c0_34 = arith.constant 0 : index
    %c768_35 = arith.constant 768 : index
    %53 = vector.load %arg2[%c0_34, %c768_35] : memref<2x1024xf32, #tpu.memory_space<vmem>>, vector<2x128xf32>
    %54 = arith.subf %52, %53 : vector<2x128xf32>
    %55 = arith.mulf %54, %54 : vector<2x128xf32>
    %c0_36 = arith.constant 0 : index
    %c768_37 = arith.constant 768 : index
    %56 = vector.load %arg3[%c0_36, %c768_37] : memref<1x1024xf32, #tpu.memory_space<vmem>>, vector<1x128xf32>
    %57 = vector.broadcast %56 : vector<1x128xf32> to vector<2x128xf32>
    %58 = arith.mulf %55, %57 : vector<2x128xf32>
    %59 = arith.addf %51, %58 : vector<2x128xf32>
    %c0_38 = arith.constant 0 : index
    %c896 = arith.constant 896 : index
    %60 = vector.load %arg1[%c0_38, %c896] : memref<2x1024xf32, #tpu.memory_space<vmem>>, vector<2x128xf32>
    %c0_39 = arith.constant 0 : index
    %c896_40 = arith.constant 896 : index
    %61 = vector.load %arg2[%c0_39, %c896_40] : memref<2x1024xf32, #tpu.memory_space<vmem>>, vector<2x128xf32>
    %62 = arith.subf %60, %61 : vector<2x128xf32>
    %63 = arith.mulf %62, %62 : vector<2x128xf32>
    %c0_41 = arith.constant 0 : index
    %c896_42 = arith.constant 896 : index
    %64 = vector.load %arg3[%c0_41, %c896_42] : memref<1x1024xf32, #tpu.memory_space<vmem>>, vector<1x128xf32>
    %65 = vector.broadcast %64 : vector<1x128xf32> to vector<2x128xf32>
    %66 = arith.mulf %63, %65 : vector<2x128xf32>
    %67 = arith.addf %59, %66 : vector<2x128xf32>
    %c0_43 = arith.constant 0 : index
    %c0_44 = arith.constant 0 : index
    %68 = vector.load %arg5[%c0_43, %c0_44] : memref<2x128xf32, #tpu.memory_space<vmem>>, vector<2x128xf32>
    tpu.vector_store %arg5[%c0_43, %c0_44], %67 {strides = array<i32>} : memref<2x128xf32, #tpu.memory_space<vmem>>, vector<2x128xf32>,
    %c0_i32_45 = arith.constant 0 : i32
    %69 = arith.cmpi eq, %arg0, %c0_i32_45 : i32
    %70 = arith.extui %69 : i1 to i32
    %c0_i32_46 = arith.constant 0 : i32
    %71 = arith.cmpi ne, %70, %c0_i32_46 : i32
    scf.if %71 {
      %c0_47 = arith.constant 0 : index
      %c0_48 = arith.constant 0 : index
      %72 = vector.load %arg5[%c0_47, %c0_48] : memref<2x128xf32, #tpu.memory_space<vmem>>, vector<2x128xf32>
      %73 = vector.shape_cast %72 : vector<2x128xf32> to vector<1x2x128xf32>
      %cst = arith.constant dense<0.000000e+00> : vector<1xf32>
      %74 = vector.multi_reduction <add>, %73, %cst [1, 2] : vector<1x2x128xf32> to vector<1xf32>
      %75 = vector.shape_cast %74 : vector<1xf32> to vector<1x1x1xf32>
      %76 = vector.extract %75[0, 0, 0] : f32 from vector<1x1x1xf32>
      %77 = vector.broadcast %76 : f32 to vector<1x1xf32>
      %c0_49 = arith.constant 0 : index
      %c0_50 = arith.constant 0 : index
      %78 = vector.load %arg4[%c0_49, %c0_50] : memref<1x1xf32, #tpu.memory_space<vmem>>, vector<1x1xf32>
      tpu.vector_store %arg4[%c0_49, %c0_50], %77 {strides = array<i32>} : memref<1x1xf32, #tpu.memory_space<vmem>>, vector<1x1xf32>,
    } else {
    }
    return
  }
  func.func @transform_0(%arg0: i32) -> (i32, i32) {
    %c0_i32 = arith.constant 0 : i32
    %c0_i32_0 = arith.constant 0 : i32
    return %c0_i32, %arg0 : i32, i32
  }
  func.func @transform_1(%arg0: i32) -> (i32, i32) {
    %c0_i32 = arith.constant 0 : i32
    %c0_i32_0 = arith.constant 0 : i32
    return %c0_i32, %arg0 : i32, i32
  }
  func.func @transform_2(%arg0: i32) -> (i32, i32) {
    %c0_i32 = arith.constant 0 : i32
    %c0_i32_0 = arith.constant 0 : i32
    return %c0_i32, %arg0 : i32, i32
  }
  func.func @transform_3(%arg0: i32) -> (i32, i32) {
    %c0_i32 = arith.constant 0 : i32
    %c0_i32_0 = arith.constant 0 : i32
    %c0_i32_1 = arith.constant 0 : i32
    return %c0_i32, %c0_i32_0 : i32, i32
  }
}

</mosaic_0001>

<bundles_post_ra>
// kernel: tpu_custom_call.1
= control target key start
LH: loop header
LB: loop body
LE: loop exit
PB: predicated region body
PF: predicated region fallthrough
CT: control target
= control target key end

     0   :  { %8 = vsyncpa [#allocation4], 0  ;;  %s377_s0 = inlined_call_operand.hbm [shape: f32[2,1024], index: 0, kind: input, shape index: {}]   ;;  %s378_s1 = inlined_call_operand.hbm [shape: f32[2,1024], index: 1, kind: input, shape index: {}]   ;;  %s379_s2 = inlined_call_operand.hbm [shape: f32[1,1024], index: 2, kind: input, shape index: {}]   ;;  %s380_s3 = inlined_call_operand.hbm [shape: f32[1,1], index: 3, kind: output, shape index: {}]  }
   0x1   :  { %9 = vsyncpa [#allocation7], 0 }
   0x2   :  { %10 = vsyncpa [#allocation5], 0  ;;  %s304_s12 = smov [#allocation6]   ;;  %s305_s14 = smov [#allocation3]  }
   0x3   :  { %s27_s13 = sshll.u32 %s304_s12, 4  ;;  %s17_s15 = sshll.u32 %s305_s14, 4  ;;  %s28_s13 = int_to_ptr.vmem [resolvable:$true] %s27_s13  ;;  %s18_s15 = int_to_ptr.vmem [resolvable:$true] %s17_s15 }
   0x4   :  { %s210_s18 = scalar_lea.hbm %s378_s1, 256 }
   0x5   :  { %p211_p0 = scmp.ne.s32.totalorder %s378_s1, %s210_s18  ;;  %p214_p1 = scmp.lt.u32.totalorder %s210_s18, %s378_s1 }
   0x7   :  { %p216_p2 = pnand %p214_p1, %p211_p0 }
   0x9   :  { %219 = shalt.err (!%p216_p2)
}
   0xa   :  { %s220_s23 = scalar_lea.vmem %s28_s13, 256  ;;  %p225_p4 = scmp.lt.s32.totalorder %s28_s13, %s28_s13 }
   0xb   :  { %p221_p3 = scmp.ne.s32.totalorder %s28_s13, %s220_s23  ;;  %p226_p5 = scmp.lt.s32.totalorder %s220_s23, %s220_s23 }
   0xd   :  { %p227_p6 = por %p226_p5, %p225_p4 }
   0xf   :  { %p228_p7 = pnand %p227_p6, %p221_p3 }
  0x11   :  { %231 = shalt.err (!%p228_p7)
}
  0x12   :  { %30 = dma.hbm_to_vmem [thread:$0]  %s378_s1, 256, %s28_s13, [#allocation7]  }
  0x13   :  { %s232_s28 = scalar_lea.hbm %s377_s0, 256 }
  0x14   :  { %p233_p8 = scmp.ne.s32.totalorder %s377_s0, %s232_s28  ;;  %p236_p9 = scmp.lt.u32.totalorder %s232_s28, %s377_s0 }
  0x16   :  { %p238_p10 = pnand %p236_p9, %p233_p8 }
  0x18   :  { %241 = shalt.err (!%p238_p10)
}
  0x19   :  { %s242_s6 = scalar_lea.vmem %s18_s15, 256  ;;  %p247_p12 = scmp.lt.s32.totalorder %s18_s15, %s18_s15 }
  0x1a   :  { %p243_p11 = scmp.ne.s32.totalorder %s18_s15, %s242_s6  ;;  %p248_p13 = scmp.lt.s32.totalorder %s242_s6, %s242_s6 }
  0x1c   :  { %p249_p0 = por %p248_p13, %p247_p12 }
  0x1e   :  { %p250_p1 = pnand %p249_p0, %p243_p11 }
  0x20   :  { %253 = shalt.err (!%p250_p1)
}
  0x21   :  { %20 = dma.hbm_to_vmem [thread:$0]  %s377_s0, 256, %s18_s15, [#allocation4]  }
  0x22   :  { %s306_s8 = smov [#allocation8]   ;;  %s254_s12 = scalar_lea.hbm %s379_s2, 128 }
  0x23   :  { %s37_s9 = sshll.u32 %s306_s8, 4  ;;  %p255_p2 = scmp.ne.s32.totalorder %s379_s2, %s254_s12  ;;  %s38_s9 = int_to_ptr.vmem [resolvable:$true] %s37_s9 }
  0x24   :  { %p258_p3 = scmp.lt.u32.totalorder %s254_s12, %s379_s2 }
  0x26   :  { %p260_p4 = pnand %p258_p3, %p255_p2 }
  0x28   :  { %263 = shalt.err (!%p260_p4)
}
  0x29   :  { %s264_s18 = scalar_lea.vmem %s38_s9, 128  ;;  %p269_p6 = scmp.lt.s32.totalorder %s38_s9, %s38_s9 }
  0x2a   :  { %p265_p5 = scmp.ne.s32.totalorder %s38_s9, %s264_s18  ;;  %p270_p7 = scmp.lt.s32.totalorder %s264_s18, %s264_s18 }
  0x2c   :  { %p271_p8 = por %p270_p7, %p269_p6 }
  0x2e   :  { %p272_p9 = pnand %p271_p8, %p265_p5 }
  0x30   :  { %275 = shalt.err (!%p272_p9)
}
  0x31   :  { %40 = dma.hbm_to_vmem [thread:$0]  %s379_s2, 128, %s38_s9, [#allocation7]  }
  0x32   :  { %298 = dma.done.wait [#allocation4], 256  }
  0x33   :  { %299 = vsyncadd [#allocation4], 4294967040 }
  0x34   :  { %300 = dma.done.wait [#allocation7], 384  }
  0x35   :  { %301 = vsyncadd [#allocation7], 4294966912  ;;  %v307_v0 = vmov 0.0   ;;  %v56_v1 = vld [vmem:[#allocation3] sm:$0x3]  ;;  %vm165_vm0 = vcmask 1041408  }
  0x36   :  { %54 = vst [vmem:[#allocation2] sm:$0x3] %v307_v0  ;;  %v57_v2 = vld [vmem:[#allocation6] sm:$0x3]  ;;  %v195_v4 = vld [vmem:[#allocation8] ss:$0 sm:$0xff] }
  0x37   :  { %v58_v3 = vsub.f32 %v56_v1, %v57_v2  ;;  %v69_v5 = vld [vmem:[#allocation3 + $0x2] sm:$0x3]  ;;  %v70_v6 = vld [vmem:[#allocation6 + $0x2] sm:$0x3]  ;;  %v82_v9 = vld [vmem:[#allocation3 + $0x4] sm:$0x3] }
  0x38   :  { %v71_v8 = vsub.f32 %v69_v5, %v70_v6  ;;  %v83_v10 = vld [vmem:[#allocation6 + $0x4] sm:$0x3]  ;;  %v196_v12 = vld [vmem:[#allocation8 + $0x1] ss:$0 sm:$0xff]  ;;  %v95_v14 = vld [vmem:[#allocation3 + $0x6] sm:$0x3] }
  0x39   :  { %v59_v11 = vmul.f32 %v58_v3, %v58_v3  ;;  %v84_v13 = vsub.f32 %v82_v9, %v83_v10  ;;  %v96_v15 = vld [vmem:[#allocation6 + $0x6] sm:$0x3]  ;;  %v197_v17 = vld [vmem:[#allocation8 + $0x2] ss:$0 sm:$0xff]  ;;  %v108_v19 = vld [vmem:[#allocation3 + $0x8] sm:$0x3] }
  0x3a   :  { %v72_v16 = vmul.f32 %v71_v8, %v71_v8  ;;  %v97_v18 = vsub.f32 %v95_v14, %v96_v15  ;;  %v109_v20 = vld [vmem:[#allocation6 + $0x8] sm:$0x3]  ;;  %v121_v24 = vld [vmem:[#allocation3 + $0xa] sm:$0x3]  ;;  %v122_v25 = vld [vmem:[#allocation6 + $0xa] sm:$0x3] }
  0x3b   :  { %v67_v21 = vmul.f32 %v195_v4, %v59_v11  ;;  %v85_v22 = vmul.f32 %v84_v13, %v84_v13  ;;  %v110_v23 = vsub.f32 %v108_v19, %v109_v20  ;;  %v198_v28 = vld [vmem:[#allocation8 + $0x3] ss:$0 sm:$0xff]  ;;  %v123_v29 = vsub.f32 %v121_v24, %v122_v25  ;;  %v134_v30 = vld [vmem:[#allocation3 + $0xc] sm:$0x3]  ;;  %v135_v31 = vld [vmem:[#allocation6 + $0xc] sm:$0x3] }
  0x3c   :  { %v80_v26 = vmul.f32 %v196_v12, %v72_v16  ;;  %v98_v27 = vmul.f32 %v97_v18, %v97_v18  ;;  %v136_v35 = vsub.f32 %v134_v30, %v135_v31  ;;  %v147_v36 = vld [vmem:[#allocation3 + $0xe] sm:$0x3]  ;;  %v148_v37 = vld [vmem:[#allocation6 + $0xe] sm:$0x3]  ;;  %v199_v38 = vld [vmem:[#allocation8 + $0x4] ss:$0 sm:$0xff] }
  0x3d   :  { %v55_v7 = vld [vmem:[#allocation2] sm:$0x3]  ;;  %v93_v33 = vmul.f32 %v197_v17, %v85_v22  ;;  %v111_v34 = vmul.f32 %v110_v23, %v110_v23  ;;  %v124_v41 = vmul.f32 %v123_v29, %v123_v29  ;;  %v149_v42 = vsub.f32 %v147_v36, %v148_v37  ;;  %v200_v43 = vld [vmem:[#allocation8 + $0x5] ss:$0 sm:$0xff]  ;;  %v201_v47 = vld [vmem:[#allocation8 + $0x6] ss:$0 sm:$0xff] }
  0x3e   :  { %v68_v32 = vadd.f32 %v67_v21, %v55_v7  ;;  %v106_v40 = vmul.f32 %v198_v28, %v98_v27  ;;  %v137_v46 = vmul.f32 %v136_v35, %v136_v35  ;;  %v202_v51 = vld [vmem:[#allocation8 + $0x7] ss:$0 sm:$0xff]  ;;  %s308_s2 = smov [#allocation9]   ;;  %vm177_vm1 = vcmask 0  }
  0x3f   :  { %v119_v45 = vmul.f32 %v199_v38, %v111_v34  ;;  %v132_v49 = vmul.f32 %v200_v43, %v124_v41  ;;  %v150_v50 = vmul.f32 %v149_v42, %v149_v42  ;;  %s185_s19 = sshll.u32 %s308_s2, 4  ;;  %s186_s19 = int_to_ptr.vmem [resolvable:$true] %s185_s19 }
  0x40   :  { %v81_v39 = vadd.f32 %v80_v26, %v68_v32  ;;  %v145_v53 = vmul.f32 %v201_v47, %v137_v46  ;;  %s276_s21 = scalar_lea.vmem %s186_s19, 16  ;;  %s280_s22 = scalar_lea.vmem %s186_s19, 32 }
  0x41   :  { %v158_v55 = vmul.f32 %v202_v51, %v150_v50  ;;  %p277_p10 = scmp.ne.s32.totalorder %s186_s19, %s276_s21  ;;  %p281_p11 = scmp.lt.s32.totalorder %s186_s19, %s186_s19 }
  0x42   :  { %v94_v44 = vadd.f32 %v93_v33, %v81_v39  ;;  %p282_p12 = scmp.lt.s32.totalorder %s280_s22, %s276_s21 }
  0x44   :  { %v107_v48 = vadd.f32 %v106_v40, %v94_v44  ;;  %p283_p13 = por %p282_p12, %p281_p11 }
  0x46   :  { %v120_v52 = vadd.f32 %v119_v45, %v107_v48  ;;  %p284_p0 = pnand %p283_p13, %p277_p10 }
  0x48   :  { %v133_v54 = vadd.f32 %v132_v49, %v120_v52 }
  0x4a   :  { %v146_v56 = vadd.f32 %v145_v53, %v133_v54 }
  0x4c   :  { %v159_v57 = vadd.f32 %v158_v55, %v146_v56 }
  0x4e   :  { %160 = vst [vmem:[#allocation2] sm:$0x3] %v159_v57 }
  0x55   :  { %v164_v58 = vld [vmem:[#allocation2] sm:$0x3] }
  0x56   :  { %v166_v59 = vsel %vm165_vm0, %v164_v58, 0.0 }
  0x57   :  { %167 = vadd.xlane.f32.xlu0 %v166_v59 }
  0xe4   :  { %v168_v60 = vpop.xlane.xlu0 %167 }
  0xe5   :  { %v169_v61 = vrot.slane %v168_v60, 4 }
  0xe7   :  { %v170_v62 = vadd.f32 %v169_v61, %v168_v60 }
  0xe9   :  { %v171_v63 = vrot.slane %v170_v62, 2 }
  0xeb   :  { %v172_v0 = vadd.f32 %v171_v63, %v170_v62 }
  0xed   :  { %v173_v1 = vrot.slane %v172_v0, 1 }
  0xef   :  { %v174_v2 = vadd.f32 %v173_v1, %v172_v0 }
  0xf1   :  { %203 = vpush %v174_v2 }
 0x122   :  { %s204_s20 = spop %203 }
 0x123   :  { %v176_v3 = vstv %s204_s20 }
 0x124   :  { %178 = vst.msk [vmem:[#allocation9] sm:$0x1] %vm177_vm1, %v176_v3 }
 0x125   :  { %287 = shalt.err (!%p284_p0)
}
 0x126   :  { %s288_s25 = scalar_lea.hbm %s380_s3, 16 }
 0x127   :  { %p289_p1 = scmp.ne.s32.totalorder %s380_s3, %s288_s25  ;;  %p292_p2 = scmp.lt.u32.totalorder %s288_s25, %s380_s3 }
 0x129   :  { %p294_p3 = pnand %p292_p2, %p289_p1 }
 0x12b   :  { %297 = shalt.err (!%p294_p3)
}
 0x12c   :  { %188 = dma.vmem_to_hbm [thread:$0]  %s186_s19, 16, %s380_s3, [#allocation5]  }
 0x12d   :  { %302 = dma.done.wait [#allocation5], 16  }
 0x12e   :  { %303 = vsyncadd [#allocation5], 4294967280 }
 0x12f   :  { %192 = vsyncpa [#allocation4], 1 }
 0x130   :  { %193 = vsyncpa [#allocation7], 1 }
 0x131   :  { %194 = vsyncpa [#allocation5], 1 }

</bundles_post_ra>
